<compile_context>
chip_gen: v7x
topology: tpu7x:2x2x1
jax: 0.10.0
libtpu: 0.0.40
codegen_flags: <defaults>
</compile_context>

<pallas_src>
import functools

import jax
import jax.numpy as jnp
from jax.experimental import pallas as pl
from jax.experimental.pallas import tpu as pltpu  # noqa: F401  (TPU backend)

EPS = 1e-5
NEG_SLOPE = 0.2
LANE = 128


def _leaky(v):
    return jnp.where(v >= 0, v, NEG_SLOPE * v)


def _bn_scale_shift(v, gamma, beta):
    """Training-mode BatchNorm1d folded into a single per-feature scale/shift.

    Two-pass variance (cancellation-safe):
      mu    = E[v]; var = E[(v - mu)^2]   (biased, f32)
      scale = gamma * rsqrt(var + eps) ; shift = beta - mu * scale
    """
    mu = jnp.mean(v, axis=0, keepdims=True)
    var = jnp.mean((v - mu) ** 2, axis=0, keepdims=True)
    scale = jax.lax.rsqrt(var + EPS) * gamma
    shift = beta - mu * scale
    return v * scale + shift


def _make_kernel(has_proj, h_p, matmul_dtype, final_nl):
    """Build the ResBlock kernel (static config baked in via closure)."""

    def finish(v):
        return _leaky(v) if final_nl else v

    if has_proj:
        # Inputs: x [B,Fin_p] f32, w13 [Fin_p, H_p+Fout_p] md, w2 [H_p,Fout_p] md,
        #         aff1 [2,H_p] f32 (g1, be1), aff2 [3,Fout_p] f32 (g2, be2, b3).
        def kernel(x_ref, w13_ref, w2_ref, aff1_ref, aff2_ref, o_ref):
            xm = x_ref[...].astype(matmul_dtype)

            # Single wide matmul feeding both fc1 (main path) and fc3 (shortcut).
            hx = jnp.dot(xm, w13_ref[...],
                         preferred_element_type=jnp.float32)   # [B, H_p+Fout_p]

            # shortcut: Xin = LeakyReLU(fc3(x))   (Fin != Fout)
            xin = _leaky(hx[:, h_p:] + aff2_ref[2:3, :])        # [B, Fout_p]

            # main path: fc1 -> bn1 -> leaky -> fc2 -> bn2
            # (fc1/fc2 biases dropped: cancelled exactly by training-mode BN)
            h = _leaky(_bn_scale_shift(hx[:, :h_p],
                                       aff1_ref[0:1, :], aff1_ref[1:2, :]))
            y = jnp.dot(h.astype(matmul_dtype), w2_ref[...],
                        preferred_element_type=jnp.float32)     # [B, Fout_p]
            y = _bn_scale_shift(y, aff2_ref[0:1, :], aff2_ref[1:2, :])

            o_ref[...] = finish(xin + y)
        return kernel
    else:
        # Identity shortcut (Fin == Fout): aff2 is [2, Fout_p] (g2, be2).
        def kernel(x_ref, w1_ref, w2_ref, aff1_ref, aff2_ref, o_ref):
            x = x_ref[...]                                       # [B, F_p] f32
            xm = x.astype(matmul_dtype)

            h = jnp.dot(xm, w1_ref[...],
                        preferred_element_type=jnp.float32)
            h = _leaky(_bn_scale_shift(h, aff1_ref[0:1, :], aff1_ref[1:2, :]))

            y = jnp.dot(h.astype(matmul_dtype), w2_ref[...],
                        preferred_element_type=jnp.float32)
            y = _bn_scale_shift(y, aff2_ref[0:1, :], aff2_ref[1:2, :])

            o_ref[...] = finish(x + y)
        return kernel


def _round_up(n, m=LANE):
    return ((n + m - 1) // m) * m


def _pad2(a, rows, cols):
    pr, pc = rows - a.shape[0], cols - a.shape[1]
    if pr == 0 and pc == 0:
        return a
    return jnp.pad(a, ((0, pr), (0, pc)))


def prepare_params(params, *, matmul_dtype=jnp.bfloat16):
    """One-time weight preparation.  Call ONCE and reuse across forwards.

    Transposes to [in, out], zero-pads every feature (lane) dim to a multiple
    of 128, casts matmul operands to `matmul_dtype`, fuses w1||w3 into a single
    wide RHS, and packs the per-feature affine vectors into 2 inputs.
    Returns (prepped_dict, Fout).
    """
    f32 = jnp.float32
    H, Fin = params["w1"].shape
    Fout = params["w2"].shape[0]
    has_proj = "w3" in params
    if not has_proj:
        assert Fin == Fout, "identity shortcut requires Fin == Fout"

    Fin_p, H_p, Fout_p = _round_up(Fin), _round_up(H), _round_up(Fout)

    w1 = _pad2(params["w1"].astype(f32).T, Fin_p, H_p)
    w2 = _pad2(params["w2"].astype(f32).T, H_p, Fout_p).astype(matmul_dtype)
    aff1 = _pad2(jnp.stack([params["bn1_gamma"],
                            params["bn1_beta"]]).astype(f32), 2, H_p)
    # NOTE: b1 / b2 intentionally not passed (absorbed by training-mode BN).

    prepped = {"w2": w2, "aff1": aff1}
    if has_proj:
        w3 = _pad2(params["w3"].astype(f32).T, Fin_p, Fout_p)
        # Fuse the two matmuls that share LHS x -> one wide MXU pass.
        prepped["w13"] = jnp.concatenate([w1, w3], axis=1).astype(matmul_dtype)
        prepped["aff2"] = _pad2(jnp.stack([params["bn2_gamma"],
                                           params["bn2_beta"],
                                           params["b3"]]).astype(f32), 3, Fout_p)
    else:
        prepped["w1"] = w1.astype(matmul_dtype)
        prepped["aff2"] = _pad2(jnp.stack([params["bn2_gamma"],
                                           params["bn2_beta"]]).astype(f32),
                                2, Fout_p)
    return prepped, Fout


def resblock_forward(x, prepped, *, fout, final_nl=True):
    """x: [B, Fin] f32.  prepped: output of prepare_params.  Jit-friendly."""
    B, Fin = x.shape
    has_proj = "w13" in prepped
    w_main = prepped["w13"] if has_proj else prepped["w1"]
    Fin_p = w_main.shape[0]
    H_p, Fout_p = prepped["w2"].shape
    md = w_main.dtype
    if not has_proj:
        assert Fin == fout, "identity shortcut requires Fin == Fout"

    # Batch is NOT padded: training-mode BN uses full-batch statistics.
    x_p = _pad2(x.astype(jnp.float32), B, Fin_p)
    ins = [x_p, w_main, prepped["w2"], prepped["aff1"], prepped["aff2"]]

    flops = 2 * B * (Fin_p * w_main.shape[1] + H_p * Fout_p)
    bytes_accessed = sum(int(a.size) * a.dtype.itemsize for a in ins) \
        + B * Fout_p * 4
    cost = pl.CostEstimate(flops=flops,
                           transcendentals=H_p + Fout_p,
                           bytes_accessed=bytes_accessed)

    kernel = _make_kernel(has_proj, H_p, md, final_nl)
    full = lambda a: pl.BlockSpec(a.shape, lambda: (0,) * a.ndim)

    out_p = pl.pallas_call(
        kernel,
        out_shape=jax.ShapeDtypeStruct((B, Fout_p), jnp.float32),
        in_specs=[full(a) for a in ins],
        out_specs=pl.BlockSpec((B, Fout_p), lambda: (0, 0)),
        cost_estimate=cost,
    )(*ins)

    return out_p[:, :fout]


def _reference(x, params, matmul_dtype=jnp.float32):
    """Pure-JAX reference, faithful to the PyTorch module (training-mode BN,
    biases kept).  `matmul_dtype` mirrors the kernel's operand cast."""

    def dot(a, w_t):
        return jnp.dot(a.astype(matmul_dtype), w_t.astype(matmul_dtype),
                       preferred_element_type=jnp.float32)

    def bn(v, g, b):
        mu = jnp.mean(v, axis=0, keepdims=True)
        var = jnp.mean((v - mu) ** 2, axis=0, keepdims=True)
        return (v - mu) / jnp.sqrt(var + EPS) * g + b

    def ll(v):
        return jnp.where(v >= 0, v, NEG_SLOPE * v)

    if "w3" in params:
        xin = ll(dot(x, params["w3"].T) + params["b3"])
    else:
        xin = x
    h = dot(x, params["w1"].T) + params["b1"]
    h = ll(bn(h, params["bn1_gamma"], params["bn1_beta"]))
    y = dot(h, params["w2"].T) + params["b2"]
    y = bn(y, params["bn2_gamma"], params["bn2_beta"])
    return ll(xin + y)


def _make_params(key, Fin, Fout, H, with_proj=True):
    keys = jax.random.split(key, 8)
    params = {
        "w1": 0.05 * jax.random.normal(keys[0], (H, Fin), dtype=jnp.float32),
        "b1": 0.01 * jax.random.normal(keys[1], (H,), dtype=jnp.float32),
        "w2": 0.05 * jax.random.normal(keys[2], (Fout, H), dtype=jnp.float32),
        "b2": 0.01 * jax.random.normal(keys[3], (Fout,), dtype=jnp.float32),
        "bn1_gamma": 1.0 + 0.1 * jax.random.normal(keys[4], (H,), dtype=jnp.float32),
        "bn1_beta": 0.1 * jax.random.normal(keys[5], (H,), dtype=jnp.float32),
        "bn2_gamma": jnp.ones((Fout,), jnp.float32),
        "bn2_beta": jnp.zeros((Fout,), jnp.float32),
    }
    if with_proj:
        params["w3"] = 0.05 * jax.random.normal(keys[6], (Fout, Fin), dtype=jnp.float32)
        params["b3"] = 0.01 * jax.random.normal(keys[7], (Fout,), dtype=jnp.float32)
    return params


if __name__ == "__main__":
    # Small shapes consistent with the module: Fin != Fout so fc3 exists.
    B, Fin, Fout, H = 8, 16, 32, 64

    key = jax.random.PRNGKey(0)
    kx, kp, kp2 = jax.random.split(key, 3)

    x = jax.random.normal(kx, (B, Fin), dtype=jnp.float32)
    params = _make_params(kp, Fin, Fout, H, with_proj=True)

    fwd = jax.jit(resblock_forward, static_argnames=("fout", "final_nl"))

    # 1) f32 MXU operands: strict check against the pure-f32 reference.
    prep_f32, fout = prepare_params(params, matmul_dtype=jnp.float32)
    out_f32 = jax.block_until_ready(fwd(x, prep_f32, fout=fout))
    ref_f32 = _reference(x, params, matmul_dtype=jnp.float32)
    assert out_f32.shape == (B, Fout)
    assert jnp.allclose(out_f32, ref_f32, atol=1e-4, rtol=1e-4), \
        "f32 path mismatch vs reference"

    # 2) bf16 MXU operands (f32 accumulate), checked against a reference that
    #    performs the same operand cast.
    prep_bf, _ = prepare_params(params, matmul_dtype=jnp.bfloat16)
    out_bf = jax.block_until_ready(fwd(x, prep_bf, fout=fout))
    ref_bf = _reference(x, params, matmul_dtype=jnp.bfloat16)
    assert jnp.allclose(out_bf, ref_bf, atol=2e-2, rtol=2e-2), \
        "bf16 path mismatch vs reference"

    # 3) Identity-shortcut path (Fin == Fout, no fc3).
    Fin2 = Fout2 = 32
    x2 = jax.random.normal(jax.random.fold_in(kx, 1), (B, Fin2), dtype=jnp.float32)
    params2 = _make_params(kp2, Fin2, Fout2, H, with_proj=False)
    prep2, fout2 = prepare_params(params2, matmul_dtype=jnp.float32)
    out2 = jax.block_until_ready(fwd(x2, prep2, fout=fout2))
    ref2 = _reference(x2, params2, matmul_dtype=jnp.float32)
    assert out2.shape == (B, Fout2)
    assert jnp.allclose(out2, ref2, atol=1e-4, rtol=1e-4), \
        "identity-shortcut path mismatch vs reference"

    print("KERNEL_OK")
</pallas_src>

<mosaic_0001>
module attributes {stable_mosaic.version = 11 : i64} {
  func.func @kernel(%arg0: memref<8x128xf32, #tpu.memory_space<vmem>>, %arg1: memref<128x256xf32, #tpu.memory_space<vmem>>, %arg2: memref<128x128xf32, #tpu.memory_space<vmem>>, %arg3: memref<2x128xf32, #tpu.memory_space<vmem>>, %arg4: memref<3x128xf32, #tpu.memory_space<vmem>>, %arg5: memref<8x128xf32, #tpu.memory_space<vmem>>) attributes {dimension_semantics = [], scalar_prefetch = 0 : i64, scratch_operands = 0 : i64, tpu.core_type = #tpu.core_type<tc>} {
    %c0 = arith.constant 0 : index
    %c0_0 = arith.constant 0 : index
    %0 = vector.load %arg0[%c0, %c0_0] : memref<8x128xf32, #tpu.memory_space<vmem>>, vector<8x128xf32>
    %c0_1 = arith.constant 0 : index
    %c0_2 = arith.constant 0 : index
    %1 = vector.load %arg1[%c0_1, %c0_2] : memref<128x256xf32, #tpu.memory_space<vmem>>, vector<128x256xf32>
    %cst = arith.constant dense<0.000000e+00> : vector<8x256xf32>
    %2 = tpu.matmul %0, %1, %cst {dimension_numbers = #tpu.dot_dimension_numbers<[1], [0], [0], [1], [0, 0, 1, 1], [], []>} : vector<8x128xf32>, vector<128x256xf32>, vector<8x256xf32> -> vector<8x256xf32>
    %3 = vector.extract_strided_slice %2 {offsets = [0, 128], sizes = [8, 128], strides = [1, 1]} : vector<8x256xf32> to vector<8x128xf32>
    %c2 = arith.constant 2 : index
    %c0_3 = arith.constant 0 : index
    %4 = vector.load %arg4[%c2, %c0_3] : memref<3x128xf32, #tpu.memory_space<vmem>>, vector<1x128xf32>
    %5 = vector.broadcast %4 : vector<1x128xf32> to vector<8x128xf32>
    %6 = arith.addf %3, %5 : vector<8x128xf32>
    %cst_4 = arith.constant 0.000000e+00 : f32
    %7 = vector.broadcast %cst_4 : f32 to vector<8x128xf32>
    %8 = arith.cmpf oge, %6, %7 : vector<8x128xf32>
    %cst_5 = arith.constant 2.000000e-01 : f32
    %9 = vector.broadcast %cst_5 : f32 to vector<8x128xf32>
    %10 = arith.mulf %9, %6 : vector<8x128xf32>
    %11 = arith.select %8, %6, %10 : vector<8x128xi1>, vector<8x128xf32>
    %12 = vector.extract_strided_slice %2 {offsets = [0, 0], sizes = [8, 128], strides = [1, 1]} : vector<8x256xf32> to vector<8x128xf32>
    %c0_6 = arith.constant 0 : index
    %c0_7 = arith.constant 0 : index
    %13 = vector.load %arg3[%c0_6, %c0_7] : memref<2x128xf32, #tpu.memory_space<vmem>>, vector<1x128xf32>
    %c1 = arith.constant 1 : index
    %c0_8 = arith.constant 0 : index
    %14 = vector.load %arg3[%c1, %c0_8] : memref<2x128xf32, #tpu.memory_space<vmem>>, vector<1x128xf32>
    %cst_9 = arith.constant dense<0.000000e+00> : vector<128xf32>
    %15 = vector.multi_reduction <add>, %12, %cst_9 [0] : vector<8x128xf32> to vector<128xf32>
    %16 = vector.shape_cast %15 : vector<128xf32> to vector<1x128xf32>
    %cst_10 = arith.constant 8.000000e+00 : f32
    %17 = vector.broadcast %cst_10 : f32 to vector<1x128xf32>
    %18 = arith.divf %16, %17 : vector<1x128xf32>
    %19 = vector.broadcast %18 : vector<1x128xf32> to vector<8x128xf32>
    %20 = arith.subf %12, %19 : vector<8x128xf32>
    %21 = arith.mulf %20, %20 : vector<8x128xf32>
    %cst_11 = arith.constant dense<0.000000e+00> : vector<128xf32>
    %22 = vector.multi_reduction <add>, %21, %cst_11 [0] : vector<8x128xf32> to vector<128xf32>
    %23 = vector.shape_cast %22 : vector<128xf32> to vector<1x128xf32>
    %cst_12 = arith.constant 8.000000e+00 : f32
    %24 = vector.broadcast %cst_12 : f32 to vector<1x128xf32>
    %25 = arith.divf %23, %24 : vector<1x128xf32>
    %cst_13 = arith.constant 9.99999974E-6 : f32
    %26 = vector.broadcast %cst_13 : f32 to vector<1x128xf32>
    %27 = arith.addf %25, %26 : vector<1x128xf32>
    %28 = math.rsqrt %27 : vector<1x128xf32>
    %29 = arith.mulf %28, %13 : vector<1x128xf32>
    %30 = arith.mulf %18, %29 : vector<1x128xf32>
    %31 = arith.subf %14, %30 : vector<1x128xf32>
    %32 = vector.broadcast %29 : vector<1x128xf32> to vector<8x128xf32>
    %33 = arith.mulf %12, %32 : vector<8x128xf32>
    %34 = vector.broadcast %31 : vector<1x128xf32> to vector<8x128xf32>
    %35 = arith.addf %33, %34 : vector<8x128xf32>
    %cst_14 = arith.constant 0.000000e+00 : f32
    %36 = vector.broadcast %cst_14 : f32 to vector<8x128xf32>
    %37 = arith.cmpf oge, %35, %36 : vector<8x128xf32>
    %cst_15 = arith.constant 2.000000e-01 : f32
    %38 = vector.broadcast %cst_15 : f32 to vector<8x128xf32>
    %39 = arith.mulf %38, %35 : vector<8x128xf32>
    %40 = arith.select %37, %35, %39 : vector<8x128xi1>, vector<8x128xf32>
    %c0_16 = arith.constant 0 : index
    %c0_17 = arith.constant 0 : index
    %41 = vector.load %arg2[%c0_16, %c0_17] : memref<128x128xf32, #tpu.memory_space<vmem>>, vector<128x128xf32>
    %cst_18 = arith.constant dense<0.000000e+00> : vector<8x128xf32>
    %42 = tpu.matmul %40, %41, %cst_18 {dimension_numbers = #tpu.dot_dimension_numbers<[1], [0], [0], [1], [0, 0, 1, 1], [], []>} : vector<8x128xf32>, vector<128x128xf32>, vector<8x128xf32> -> vector<8x128xf32>
    %c0_19 = arith.constant 0 : index
    %c0_20 = arith.constant 0 : index
    %43 = vector.load %arg4[%c0_19, %c0_20] : memref<3x128xf32, #tpu.memory_space<vmem>>, vector<1x128xf32>
    %c1_21 = arith.constant 1 : index
    %c0_22 = arith.constant 0 : index
    %44 = vector.load %arg4[%c1_21, %c0_22] : memref<3x128xf32, #tpu.memory_space<vmem>>, vector<1x128xf32>
    %cst_23 = arith.constant dense<0.000000e+00> : vector<128xf32>
    %45 = vector.multi_reduction <add>, %42, %cst_23 [0] : vector<8x128xf32> to vector<128xf32>
    %46 = vector.shape_cast %45 : vector<128xf32> to vector<1x128xf32>
    %cst_24 = arith.constant 8.000000e+00 : f32
    %47 = vector.broadcast %cst_24 : f32 to vector<1x128xf32>
    %48 = arith.divf %46, %47 : vector<1x128xf32>
    %49 = vector.broadcast %48 : vector<1x128xf32> to vector<8x128xf32>
    %50 = arith.subf %42, %49 : vector<8x128xf32>
    %51 = arith.mulf %50, %50 : vector<8x128xf32>
    %cst_25 = arith.constant dense<0.000000e+00> : vector<128xf32>
    %52 = vector.multi_reduction <add>, %51, %cst_25 [0] : vector<8x128xf32> to vector<128xf32>
    %53 = vector.shape_cast %52 : vector<128xf32> to vector<1x128xf32>
    %cst_26 = arith.constant 8.000000e+00 : f32
    %54 = vector.broadcast %cst_26 : f32 to vector<1x128xf32>
    %55 = arith.divf %53, %54 : vector<1x128xf32>
    %cst_27 = arith.constant 9.99999974E-6 : f32
    %56 = vector.broadcast %cst_27 : f32 to vector<1x128xf32>
    %57 = arith.addf %55, %56 : vector<1x128xf32>
    %58 = math.rsqrt %57 : vector<1x128xf32>
    %59 = arith.mulf %58, %43 : vector<1x128xf32>
    %60 = arith.mulf %48, %59 : vector<1x128xf32>
    %61 = arith.subf %44, %60 : vector<1x128xf32>
    %62 = vector.broadcast %59 : vector<1x128xf32> to vector<8x128xf32>
    %63 = arith.mulf %42, %62 : vector<8x128xf32>
    %64 = vector.broadcast %61 : vector<1x128xf32> to vector<8x128xf32>
    %65 = arith.addf %63, %64 : vector<8x128xf32>
    %66 = arith.addf %11, %65 : vector<8x128xf32>
    %cst_28 = arith.constant 0.000000e+00 : f32
    %67 = vector.broadcast %cst_28 : f32 to vector<8x128xf32>
    %68 = arith.cmpf oge, %66, %67 : vector<8x128xf32>
    %cst_29 = arith.constant 2.000000e-01 : f32
    %69 = vector.broadcast %cst_29 : f32 to vector<8x128xf32>
    %70 = arith.mulf %69, %66 : vector<8x128xf32>
    %71 = arith.select %68, %66, %70 : vector<8x128xi1>, vector<8x128xf32>
    %c0_30 = arith.constant 0 : index
    %c0_31 = arith.constant 0 : index
    %72 = vector.load %arg5[%c0_30, %c0_31] : memref<8x128xf32, #tpu.memory_space<vmem>>, vector<8x128xf32>
    tpu.vector_store %arg5[%c0_30, %c0_31], %71 {strides = array<i32>} : memref<8x128xf32, #tpu.memory_space<vmem>>, vector<8x128xf32>,
    return
  }
}

</mosaic_0001>

<bundles_post_ra>
// kernel: resblock_forward.1
= control target key start
LH: loop header
LB: loop body
LE: loop exit
PB: predicated region body
PF: predicated region fallthrough
CT: control target
= control target key end

     0   :  { %10 = vsyncpa [#allocation3], 0  ;;  %s630_s0 = inlined_call_operand.vmem [shape: f32[8,128], index: 0, kind: input, shape index: {}]   ;;  %s631_s1 = inlined_call_operand.hbm [shape: f32[128,256], index: 1, kind: input, shape index: {}]   ;;  %s632_s2 = inlined_call_operand.hbm [shape: f32[128,128], index: 2, kind: input, shape index: {}]   ;;  %s633_s3 = inlined_call_operand.vmem [shape: f32[2,128], index: 3, kind: input, shape index: {}]   ;;  %s634_s4 = inlined_call_operand.vmem [shape: f32[3,128], index: 4, kind: input, shape index: {}]   ;;  %s635_s5 = inlined_call_operand.hbm [shape: f32[8,128], index: 5, kind: output, shape index: {}]  }
   0x1   :  { %11 = vsyncpa [#allocation6], 0 }
   0x2   :  { %12 = vsyncpa [#allocation4], 0  ;;  %s534_s18 = smov [#allocation2]   ;;  %s462_s22 = scalar_lea.hbm %s631_s1, 4096 }
   0x3   :  { %s20_s19 = sshll.u32 %s534_s18, 4  ;;  %p463_p0 = scmp.ne.s32.totalorder %s631_s1, %s462_s22  ;;  %s21_s19 = int_to_ptr.vmem [resolvable:$true] %s20_s19 }
   0x4   :  { %p466_p1 = scmp.lt.u32.totalorder %s462_s22, %s631_s1 }
   0x6   :  { %p468_p2 = pnand %p466_p1, %p463_p0 }
   0x8   :  { %471 = shalt.err (!%p468_p2)
}
   0x9   :  { %s472_s27 = scalar_lea.vmem %s21_s19, 4096  ;;  %p477_p4 = scmp.lt.s32.totalorder %s21_s19, %s21_s19 }
   0xa   :  { %p473_p3 = scmp.ne.s32.totalorder %s21_s19, %s472_s27  ;;  %p478_p5 = scmp.lt.s32.totalorder %s472_s27, %s472_s27 }
   0xc   :  { %p479_p6 = por %p478_p5, %p477_p4 }
   0xe   :  { %p480_p7 = pnand %p479_p6, %p473_p3 }
  0x10   :  { %483 = shalt.err (!%p480_p7)
}
  0x11   :  { %s535_s28 = smov 256   ;;  %s536_s29 = smov 16  }
  0x12   :  { %26 = dma.hbm_to_vmem [thread:$0]  %s631_s1, 4096, %s21_s19, [#allocation3], %s535_s28, %s535_s28, %s536_s29  }
  0x13   :  { %s537_s7 = smov [#allocation5]   ;;  %s484_s11 = scalar_lea.hbm %s632_s2, 2048 }
  0x14   :  { %s32_s8 = sshll.u32 %s537_s7, 4  ;;  %p485_p8 = scmp.ne.s32.totalorder %s632_s2, %s484_s11  ;;  %s33_s8 = int_to_ptr.vmem [resolvable:$true] %s32_s8 }
  0x15   :  { %p488_p9 = scmp.lt.u32.totalorder %s484_s11, %s632_s2 }
  0x17   :  { %p490_p10 = pnand %p488_p9, %p485_p8 }
  0x19   :  { %493 = shalt.err (!%p490_p10)
}
  0x1a   :  { %s494_s16 = scalar_lea.vmem %s33_s8, 2048  ;;  %p499_p12 = scmp.lt.s32.totalorder %s33_s8, %s33_s8 }
  0x1b   :  { %p495_p11 = scmp.ne.s32.totalorder %s33_s8, %s494_s16  ;;  %p500_p13 = scmp.lt.s32.totalorder %s494_s16, %s494_s16 }
  0x1d   :  { %p501_p0 = por %p500_p13, %p499_p12 }
  0x1f   :  { %p502_p1 = pnand %p501_p0, %p495_p11 }
  0x21   :  { %505 = shalt.err (!%p502_p1)
}
  0x22   :  { %s538_s1 = smov 128   ;;  %s539_s17 = smov 8  }
  0x23   :  { %38 = dma.hbm_to_vmem [thread:$0]  %s632_s2, 2048, %s33_s8, [#allocation6], %s538_s1, %s538_s1, %s539_s17  }
  0x24   :  { %528 = dma.done.wait [#allocation3], 4096  }
  0x25   :  { %529 = vsyncadd [#allocation3], 4294963200 }
  0x26   :  { %530 = dma.done.wait [#allocation6], 2048  }
  0x27   :  { %531 = vsyncadd [#allocation6], 4294965248  ;;  %v540_v0 = vmov 0.0   ;;  %v51_v1 = vld [vmem:[#allocation2 + $0x8] sm:$0xff]  ;;  %v53_v2 = vld [vmem:[#allocation2 + $0x18] sm:$0xff]  ;;  %v541_v53 = vmov 0.0|0.0  }
  0x28   :  { %146 = vmatprep.mubr.f32.mxu0 %v540_v0  ;;  %v50_v3 = vld [vmem:[#allocation2] sm:$0xff]  ;;  %v392_v4 = vpack.c.bf16 %v53_v2, %v51_v1  ;;  %v52_v5 = vld [vmem:[#allocation2 + $0x10] sm:$0xff]  ;;  %v55_v6 = vld [vmem:[#allocation2 + $0x28] sm:$0xff]  ;;  %424 = vmatprep.subr.bf16.mxu1 %v541_v53  ;;  %vm542_vm0 = vmmov 0   ;;  %s543_s29 = smov [#allocation7]  }
  0x29   :  { %v57_v7 = vld [vmem:[#allocation2 + $0x38] sm:$0xff]  ;;  %v394_v8 = vpack.c.bf16 %v52_v5, %v50_v3  ;;  %v54_v10 = vld [vmem:[#allocation2 + $0x20] sm:$0xff]  ;;  %v56_v11 = vld [vmem:[#allocation2 + $0x30] sm:$0xff]  ;;  %389 = vmatprep.mubr.msk.f32.mxu1 %vm542_vm0, %v540_v0  ;;  %s329_s30 = sshll.u32 %s543_s29, 4  ;;  %s330_s30 = int_to_ptr.vmem [resolvable:$true] %s329_s30 }
  0x2a   :  { %v396_v9 = vpack.c.bf16 %v57_v7, %v55_v6  ;;  %v59_v12 = vld [vmem:[#allocation2 + $0x48] sm:$0xff]  ;;  %393 = vmatprep.subr.bf16.mxu0 %v392_v4  ;;  %v61_v13 = vld [vmem:[#allocation2 + $0x58] sm:$0xff]  ;;  %v398_v14 = vpack.c.bf16 %v56_v11, %v54_v10  ;;  %v58_v16 = vld [vmem:[#allocation2 + $0x40] sm:$0xff]  ;;  %s506_s6 = scalar_lea.vmem %s330_s30, 128  ;;  %p511_p3 = scmp.lt.s32.totalorder %s330_s30, %s330_s30 }
  0x2b   :  { %395 = vmatpush1.bf16.msra.mxu0 %v394_v8  ;;  %v400_v15 = vpack.c.bf16 %v61_v13, %v59_v12  ;;  %v60_v17 = vld [vmem:[#allocation2 + $0x50] sm:$0xff]  ;;  %v63_v18 = vld [vmem:[#allocation2 + $0x68] sm:$0xff]  ;;  %v65_v19 = vld [vmem:[#allocation2 + $0x78] sm:$0xff]  ;;  %p507_p2 = scmp.ne.s32.totalorder %s330_s30, %s506_s6  ;;  %p512_p4 = scmp.lt.s32.totalorder %s506_s6, %s506_s6 }
  0x2c   :  { %397 = vmatprep.subr.bf16.mxu0 %v396_v9  ;;  %v402_v20 = vpack.c.bf16 %v60_v17, %v58_v16  ;;  %v404_v21 = vpack.c.bf16 %v65_v19, %v63_v18  ;;  %v62_v22 = vld [vmem:[#allocation2 + $0x60] sm:$0xff]  ;;  %v64_v23 = vld [vmem:[#allocation2 + $0x70] sm:$0xff]  ;;  %v67_v24 = vld [vmem:[#allocation2 + $0x88] sm:$0xff] }
  0x2d   :  { %v69_v25 = vld [vmem:[#allocation2 + $0x98] sm:$0xff]  ;;  %v406_v26 = vpack.c.bf16 %v64_v23, %v62_v22  ;;  %v66_v28 = vld [vmem:[#allocation2 + $0x80] sm:$0xff]  ;;  %v68_v29 = vld [vmem:[#allocation2 + $0x90] sm:$0xff]  ;;  %p513_p5 = por %p512_p4, %p511_p3 }
  0x2e   :  { %v408_v27 = vpack.c.bf16 %v69_v25, %v67_v24  ;;  %v71_v30 = vld [vmem:[#allocation2 + $0xa8] sm:$0xff]  ;;  %v73_v31 = vld [vmem:[#allocation2 + $0xb8] sm:$0xff]  ;;  %v410_v32 = vpack.c.bf16 %v68_v29, %v66_v28  ;;  %v70_v34 = vld [vmem:[#allocation2 + $0xa0] sm:$0xff] }
  0x2f   :  { %399 = vmatpush1.bf16.msra.mxu0 %v398_v14  ;;  %v412_v33 = vpack.c.bf16 %v73_v31, %v71_v30  ;;  %v72_v35 = vld [vmem:[#allocation2 + $0xb0] sm:$0xff]  ;;  %v75_v36 = vld [vmem:[#allocation2 + $0xc8] sm:$0xff]  ;;  %v77_v37 = vld [vmem:[#allocation2 + $0xd8] sm:$0xff]  ;;  %v186_v30 = vlaneseq  ;;  %p514_p6 = pnand %p513_p5, %p507_p2 }
  0x30   :  { %401 = vmatprep.subr.bf16.mxu0 %v400_v15  ;;  %v414_v38 = vpack.c.bf16 %v72_v35, %v70_v34  ;;  %v416_v39 = vpack.c.bf16 %v77_v37, %v75_v36  ;;  %v74_v40 = vld [vmem:[#allocation2 + $0xc0] sm:$0xff]  ;;  %v76_v41 = vld [vmem:[#allocation2 + $0xd0] sm:$0xff]  ;;  %v79_v42 = vld [vmem:[#allocation2 + $0xe8] sm:$0xff] }
  0x31   :  { %v81_v43 = vld [vmem:[#allocation2 + $0xf8] sm:$0xff]  ;;  %v418_v44 = vpack.c.bf16 %v76_v41, %v74_v40  ;;  %v78_v46 = vld [vmem:[#allocation2 + $0xe0] sm:$0xff]  ;;  %v80_v47 = vld [vmem:[#allocation2 + $0xf0] sm:$0xff]  ;;  %v187_v31 = vshrl.u32 %v186_v30, 7 }
  0x32   :  { %v420_v45 = vpack.c.bf16 %v81_v43, %v79_v42  ;;  %v422_v48 = vpack.c.bf16 %v80_v47, %v78_v46  ;;  %v49_v49 = vld [vmem:[%s630_s0] sm:$0xff]  ;;  %v199_v50 = vld [vmem:[#allocation5] sm:$0xff]  ;;  %v200_v51 = vld [vmem:[#allocation5 + $0x8] sm:$0xff] }
  0x33   :  { %403 = vmatpush1.bf16.msra.mxu0 %v402_v20  ;;  %v425_v52 = vpack.c.bf16 %v200_v51, %v199_v50  ;;  %v201_v54 = vld [vmem:[#allocation5 + $0x10] sm:$0xff]  ;;  %v202_v55 = vld [vmem:[#allocation5 + $0x18] sm:$0xff]  ;;  %v203_v57 = vld [vmem:[#allocation5 + $0x20] sm:$0xff] }
  0x34   :  { %405 = vmatprep.subr.bf16.mxu0 %v404_v21  ;;  %v428_v56 = vpack.c.bf16 %v202_v55, %v201_v54  ;;  %v204_v58 = vld [vmem:[#allocation5 + $0x28] sm:$0xff]  ;;  %v205_v60 = vld [vmem:[#allocation5 + $0x30] sm:$0xff]  ;;  %v206_v61 = vld [vmem:[#allocation5 + $0x38] sm:$0xff] }
  0x35   :  { %426 = vmatpush3.bf16.msra.mxu1 %v425_v52  ;;  %v431_v59 = vpack.c.bf16 %v204_v58, %v203_v57  ;;  %v434_v62 = vpack.c.bf16 %v206_v61, %v205_v60  ;;  %v207_v63 = vld [vmem:[#allocation5 + $0x40] sm:$0xff]  ;;  %v208_v1 = vld [vmem:[#allocation5 + $0x48] sm:$0xff]  ;;  %v209_v3 = vld [vmem:[#allocation5 + $0x50] sm:$0xff] }
  0x36   :  { %427 = vmatprep.subr.bf16.mxu1 %v541_v53  ;;  %v437_v2 = vpack.c.bf16 %v208_v1, %v207_v63  ;;  %v210_v4 = vld [vmem:[#allocation5 + $0x58] sm:$0xff]  ;;  %v211_v6 = vld [vmem:[#allocation5 + $0x60] sm:$0xff]  ;;  %v212_v7 = vld [vmem:[#allocation5 + $0x68] sm:$0xff] }
  0x37   :  { %407 = vmatpush1.bf16.msra.mxu0 %v406_v26  ;;  %v440_v5 = vpack.c.bf16 %v210_v4, %v209_v3  ;;  %v443_v8 = vpack.c.bf16 %v212_v7, %v211_v6  ;;  %v213_v9 = vld [vmem:[#allocation5 + $0x70] sm:$0xff]  ;;  %v214_v10 = vld [vmem:[#allocation5 + $0x78] sm:$0xff] }
  0x38   :  { %409 = vmatprep.subr.bf16.mxu0 %v408_v27  ;;  %v446_v11 = vpack.c.bf16 %v214_v10, %v213_v9  ;;  %v163_v36 = vld [vmem:[%s633_s3 + $0x1] sm:$0x1]  ;;  %v285_v1 = vld [vmem:[%s634_s4] sm:$0x1] }
  0x39   :  { %429 = vmatpush3.bf16.msra.mxu1 %v428_v56  ;;  %v286_v6 = vld [vmem:[%s634_s4 + $0x1] sm:$0x1] }
  0x3a   :  { %430 = vmatprep.subr.bf16.mxu1 %v541_v53 }
  0x3b   :  { %411 = vmatpush1.bf16.msra.mxu0 %v410_v32  ;;  %v162_v32 = vld [vmem:[%s633_s3] sm:$0x1] }
  0x3c   :  { %413 = vmatprep.subr.bf16.mxu0 %v412_v33  ;;  %v188_v33 = vsub.s32 0, %v187_v31 }
  0x3d   :  { %432 = vmatpush3.bf16.msra.mxu1 %v431_v59 }
  0x3e   :  { %433 = vmatprep.subr.bf16.mxu1 %v541_v53 }
  0x3f   :  { %415 = vmatpush1.bf16.msra.mxu0 %v414_v38 }
  0x40   :  { %417 = vmatprep.subr.bf16.mxu0 %v416_v39 }
  0x41   :  { %435 = vmatpush3.bf16.msra.mxu1 %v434_v62 }
  0x42   :  { %436 = vmatprep.subr.bf16.mxu1 %v541_v53 }
  0x43   :  { %419 = vmatpush1.bf16.msra.mxu0 %v418_v44 }
  0x44   :  { %421 = vmatprep.subr.bf16.mxu0 %v420_v45 }
  0x45   :  { %438 = vmatpush3.bf16.msra.mxu1 %v437_v2  ;;  %v339_v2 = vld [vmem:[%s634_s4 + $0x2] ss:$0 sm:$0xff] }
  0x46   :  { %439 = vmatprep.subr.bf16.mxu1 %v541_v53 }
  0x47   :  { %423 = vmatpush1.bf16.msra.mxu0 %v422_v48 }
  0x49   :  { %441 = vmatpush3.bf16.msra.mxu1 %v440_v5 }
  0x4a   :  { %147 = vmatmul.mubr.f32.vlgmr.msra.gmra.mrb[0].mxu0 %v49_v49  ;;  %442 = vmatprep.subr.bf16.mxu1 %v541_v53 }
  0x4d   :  { %444 = vmatpush3.bf16.msra.mxu1 %v443_v8 }
  0x4e   :  { %445 = vmatprep.subr.bf16.mxu1 %v541_v53 }
  0x51   :  { %447 = vmatpush3.bf16.msra.mxu1 %v446_v11 }
 0x11d   :  { %v148_v12 = vpop.f32.mrb[0].mxu0 }
 0x11e   :  { %v164_v13 = vrot.slane %v148_v12, 4  ;;  %v150_v14 = vpop.f32.mrb[1].mxu0 }
 0x11f   :  { %v158_v5 = vadd.f32 %v339_v2, %v150_v14 }
 0x120   :  { %v165_v15 = vadd.f32 %v164_v13, %v148_v12 }
 0x121   :  { %v160_v10 = vmul.f32 0.2, %v158_v5  ;;  %vm159_vm2 = vcmp.ge.f32.partialorder %v158_v5, 0.0 }
 0x122   :  { %v166_v16 = vrot.slane %v165_v15, 2 }
 0x124   :  { %v167_v17 = vadd.f32 %v166_v16, %v165_v15  ;;  %v161_v15 = vsel %vm159_vm2, %v158_v5, %v160_v10 }
 0x126   :  { %v168_v18 = vrot.slane %v167_v17, 1 }
 0x128   :  { %v169_v19 = vadd.f32 %v168_v18, %v167_v17 }
 0x12a   :  { %v171_v20 = vmul.f32 0.125, %v169_v19 }
 0x12c   :  { %v172_v21 = vsub.f32 %v148_v12, %v171_v20 }
 0x12e   :  { %v173_v22 = vmul.f32 %v172_v21, %v172_v21 }
 0x130   :  { %v174_v23 = vrot.slane %v173_v22, 4 }
 0x132   :  { %v175_v24 = vadd.f32 %v174_v23, %v173_v22 }
 0x134   :  { %v176_v25 = vrot.slane %v175_v24, 2 }
 0x136   :  { %v177_v26 = vadd.f32 %v176_v25, %v175_v24 }
 0x138   :  { %v178_v0 = vrot.slane %v177_v26, 1 }
 0x13a   :  { %v179_v27 = vadd.f32 %v178_v0, %v177_v26 }
 0x13c   :  { %v180_v28 = vmul.f32 0.125, %v179_v27 }
 0x13e   :  { %v181_v29 = vadd.f32 1e-05, %v180_v28 }
 0x140   :  { %458 = vrsqrt.f32 %v181_v29 }
 0x14a   :  { %v459_v34 = vpop.eup %458 }
 0x14b   :  { %v183_v35 = vmul.f32 %v459_v34, %v162_v32 }
 0x14d   :  { %v184_v37 = vmul.f32 %v183_v35, %v171_v20  ;;  %v189_v38 = vrot.slane %v183_v35, %v188_v33 }
 0x14f   :  { %v185_v39 = vsub.f32 %v163_v36, %v184_v37  ;;  %v190_v40 = vmul.f32 %v189_v38, %v148_v12 }
 0x151   :  { %v194_v41 = vrot.slane %v185_v39, %v188_v33 }
 0x153   :  { %v195_v42 = vadd.f32 %v194_v41, %v190_v40 }
 0x155   :  { %vm196_vm1 = vcmp.ge.f32.partialorder %v195_v42, 0.0  ;;  %v197_v43 = vmul.f32 0.2, %v195_v42 }
 0x157   :  { %v198_v44 = vsel %vm196_vm1, %v195_v42, %v197_v43 }
 0x158   :  { %390 = vmatmul.mubr.f32.vlgmr.msra.gmra.mrb[0].mxu1 %v198_v44 }
 0x22b   :  { %v281_v45 = vpop.f32.mrb[0].mxu1 }
 0x22c   :  { %v287_v46 = vrot.slane %v281_v45, 4  ;;  %v391_v47 = vpop.f32.mrb[1].mxu1 }
 0x22e   :  { %v288_v48 = vadd.f32 %v287_v46, %v281_v45 }
 0x230   :  { %v289_v49 = vrot.slane %v288_v48, 2 }
 0x232   :  { %v290_v50 = vadd.f32 %v289_v49, %v288_v48 }
 0x234   :  { %v291_v51 = vrot.slane %v290_v50, 1 }
 0x236   :  { %v292_v52 = vadd.f32 %v291_v51, %v290_v50 }
 0x238   :  { %v293_v53 = vmul.f32 0.125, %v292_v52 }
 0x23a   :  { %v294_v54 = vsub.f32 %v281_v45, %v293_v53 }
 0x23c   :  { %v295_v55 = vmul.f32 %v294_v54, %v294_v54 }
 0x23e   :  { %v296_v56 = vrot.slane %v295_v55, 4 }
 0x240   :  { %v297_v57 = vadd.f32 %v296_v56, %v295_v55 }
 0x242   :  { %v298_v58 = vrot.slane %v297_v57, 2 }
 0x244   :  { %v299_v59 = vadd.f32 %v298_v58, %v297_v57 }
 0x246   :  { %v300_v60 = vrot.slane %v299_v59, 1 }
 0x248   :  { %v301_v61 = vadd.f32 %v300_v60, %v299_v59 }
 0x24a   :  { %v302_v62 = vmul.f32 0.125, %v301_v61 }
 0x24c   :  { %v303_v63 = vadd.f32 1e-05, %v302_v62 }
 0x24e   :  { %460 = vrsqrt.f32 %v303_v63 }
 0x258   :  { %v461_v3 = vpop.eup %460 }
 0x259   :  { %v305_v4 = vmul.f32 %v461_v3, %v285_v1 }
 0x25b   :  { %v306_v7 = vmul.f32 %v305_v4, %v293_v53  ;;  %v311_v8 = vrot.slane %v305_v4, %v188_v33 }
 0x25d   :  { %v307_v9 = vsub.f32 %v286_v6, %v306_v7  ;;  %v312_v11 = vmul.f32 %v311_v8, %v281_v45 }
 0x25f   :  { %v316_v12 = vrot.slane %v307_v9, %v188_v33 }
 0x261   :  { %v317_v13 = vadd.f32 %v316_v12, %v312_v11 }
 0x263   :  { %v318_v16 = vadd.f32 %v317_v13, %v161_v15 }
 0x265   :  { %vm319_vm3 = vcmp.ge.f32.partialorder %v318_v16, 0.0  ;;  %v320_v17 = vmul.f32 0.2, %v318_v16 }
 0x267   :  { %v321_v14 = vsel %vm319_vm3, %v318_v16, %v320_v17 }
 0x268   :  { %322 = vst [vmem:[#allocation7] sm:$0xff] %v321_v14 }
 0x269   :  { %517 = shalt.err (!%p514_p6)
}
 0x26a   :  { %s518_s8 = scalar_lea.hbm %s635_s5, 128 }
 0x26b   :  { %p519_p7 = scmp.ne.s32.totalorder %s635_s5, %s518_s8  ;;  %p522_p8 = scmp.lt.u32.totalorder %s518_s8, %s635_s5 }
 0x26d   :  { %p524_p9 = pnand %p522_p8, %p519_p7 }
 0x26f   :  { %527 = shalt.err (!%p524_p9)
}
 0x270   :  { %332 = dma.vmem_to_hbm [thread:$0]  %s330_s30, 128, %s635_s5, [#allocation4]  }
 0x271   :  { %532 = dma.done.wait [#allocation4], 128  }
 0x272   :  { %533 = vsyncadd [#allocation4], 4294967168 }
 0x273   :  { %336 = vsyncpa [#allocation3], 1 }
 0x274   :  { %337 = vsyncpa [#allocation6], 1 }
 0x275   :  { %338 = vsyncpa [#allocation4], 1 }

</bundles_post_ra>
